<compile_context>
chip_gen: v7x
topology: tpu7x:2x2x1
jax: 0.10.0
libtpu: 0.0.40
codegen_flags: <defaults>
</compile_context>

<pallas_src>
import functools

import jax
import jax.numpy as jnp
from jax import lax
from jax.experimental import pallas as pl
from jax.experimental.pallas import tpu as pltpu


# ----------------------------------------------------------------------------
# Fused forward kernel
# ----------------------------------------------------------------------------
def _autoencoder_kernel(x_ref, w1_ref, b1_ref, w2_ref, b2_ref,
                        w3_ref, b3_ref, w4_ref, b4_ref,
                        enc_ref, dec_ref, h1_ref, *, n, hq, wq):
    """Whole Autoencoder_0 forward for one batch.

    x_ref  : (n, hq+1, wq+1, 48)   padded input, space-to-depth by 4;
             channel = (r4h*4 + r4w)*3 + c for padded pixel (4*q+r4h, 4*q+r4w)
    w1_ref : (2, 2, 48, 32)  conv1 per-window weights, cols = parity*8 + co
    w2_ref : (2, 2, 32, 16)  conv2 per-window weights
    w3_ref : (16, 32)        deconv1, cols = (i*2 + j)*8 + co
    w4_ref : (32, 48)        deconv2 block-diagonal, cols = (i,j,co,i2,j2)
    b*_ref : (1, C) biases (already tiled to the fused column layouts)
    enc_ref: (R, 16)         encoder output, rows = (n, ho2, wo2)
    dec_ref: (R, 48)         decoder output, cols = (i, j, co, i2, j2)
    h1_ref : (n, hq+1, wq+1, 32) scratch: layer-1 output, zero-padded and
             space-to-depth by 2; channel = (ph*2 + pw)*8 + co
    """
    f32 = jnp.float32
    R = n * hq * wq

    # Zeroing the layer-2 input scratch provides its conv padding.
    h1_ref[...] = jnp.zeros(h1_ref.shape, f32)

    # -------- layer 1: Conv2d(3 -> 8, k3, s2, p1), 4 output parities fused ---
    # Each of the 4 (dqh, dqw) source windows is a contiguous full-channel
    # slice; the per-window weight already contains zero rows for taps that do
    # not land in that window, so the 4 dots simply accumulate.
    h1w = None
    for dqh in range(2):
        for dqw in range(2):
            patch = x_ref[:, dqh:dqh + hq, dqw:dqw + wq, :].reshape(R, 48)
            d = jnp.dot(patch, w1_ref[dqh, dqw], preferred_element_type=f32)
            h1w = d if h1w is None else h1w + d
    h1w = h1w + b1_ref[...]                      # (R, 32), cols = parity*8 + co

    # Scatter each parity's 8 channels into the space-to-depth x2 scratch.
    for p_oh in range(2):
        for p_ow in range(2):
            par = p_oh * 2 + p_ow
            cc = ((1 - p_oh) * 2 + (1 - p_ow)) * 8      # padded-coord parity
            h1_ref[:, p_oh:p_oh + hq, p_ow:p_ow + wq, cc:cc + 8] = (
                h1w[:, par * 8:par * 8 + 8].reshape(n, hq, wq, 8))

    # -------- layer 2: Conv2d(8 -> 16, k3, s2, p1), same window trick --------
    enc = None
    for h2off in range(2):
        for w2off in range(2):
            patch = h1_ref[:, h2off:h2off + hq, w2off:w2off + wq, :].reshape(R, 32)
            d = jnp.dot(patch, w2_ref[h2off, w2off], preferred_element_type=f32)
            enc = d if enc is None else enc + d
    enc = enc + b2_ref[...]
    enc_ref[...] = enc.astype(enc_ref.dtype)

    # ---- layers 3 + 4: ConvTranspose2d(k2, s2) x 2 + tanh, all (i,j) fused ---
    # stride == kernel -> per-pixel matmuls; the 4 (i,j) positions are fused
    # into one 32-wide then one 48-wide (block-diagonal) matmul, one tanh and
    # a single lane-dense store.
    d1 = jnp.dot(enc, w3_ref[...], preferred_element_type=f32) + b3_ref[...]
    out = jnp.tanh(jnp.dot(d1, w4_ref[...], preferred_element_type=f32)
                   + b4_ref[...])
    dec_ref[...] = out.astype(dec_ref.dtype)


# ----------------------------------------------------------------------------
# Host-side wrappers
# ----------------------------------------------------------------------------
def pack_params(p):
    """Repack PyTorch-layout parameters into the kernel's fused matmul layouts.

    Called once; all bias tiling / weight zero-padding is hoisted here.
    (Keeping weights in f32; a bf16 cast of the matmul operands is a further
    v6e/v7x option but is skipped to stay well inside the 5e-3 tolerance.)
    """
    f32 = jnp.float32

    # --- layer 1: per-(dqh, dqw) window weights, all 4 output parities fused.
    #     rows: input channel (r4h*4 + r4w)*3 + c of the s2d-by-4 input
    #     cols: (p_oh*2 + p_ow)*8 + co
    w1_t = p["enc1_w"].transpose(2, 3, 1, 0).astype(f32)      # (dh, dw, ci, co)
    w1_win = jnp.zeros((2, 2, 48, 32), f32)
    for p_oh in range(2):
        for p_ow in range(2):
            par = p_oh * 2 + p_ow
            for dh in range(3):
                dqh, r4h = divmod(2 * p_oh + dh, 4)
                for dw in range(3):
                    dqw, r4w = divmod(2 * p_ow + dw, 4)
                    c0 = (r4h * 4 + r4w) * 3
                    w1_win = w1_win.at[dqh, dqw, c0:c0 + 3,
                                       par * 8:par * 8 + 8].set(w1_t[dh, dw])
    b1 = jnp.tile(p["enc1_b"].astype(f32), 4).reshape(1, 32)

    # --- layer 2: per-(h2off, w2off) window weights on the s2d-by-2 scratch.
    w2_t = p["enc2_w"].transpose(2, 3, 1, 0).astype(f32)      # (dh, dw, ci, co)
    w2_win = jnp.zeros((2, 2, 32, 16), f32)
    for dh in range(3):
        h2off, ph = divmod(dh, 2)
        for dw in range(3):
            w2off, pw = divmod(dw, 2)
            c0 = (ph * 2 + pw) * 8
            w2_win = w2_win.at[h2off, w2off, c0:c0 + 8, :].set(w2_t[dh, dw])
    b2 = p["enc2_b"].astype(f32).reshape(1, 16)

    # --- decoder: fuse the 4 (i,j) positions of both transposed convs.
    # ConvTranspose2d weight (Cin, Cout, kh, kw):
    #   w3_all: (ci) -> (i, j, co)        : (16, 32)
    #   w4_blk: block-diag over (i, j)    : (32, 48), cols = (i, j, co, i2, j2)
    w3_all = p["dec1_w"].astype(f32).transpose(0, 2, 3, 1).reshape(16, 32)
    b3 = jnp.tile(p["dec1_b"].astype(f32), 4).reshape(1, 32)
    w4 = p["dec2_w"].astype(f32).reshape(8, 12)               # (ci, co*4+i2*2+j2)
    w4_blk = jnp.kron(jnp.eye(4, dtype=f32), w4)              # (32, 48)
    b4 = jnp.tile(jnp.repeat(p["dec2_b"].astype(f32), 4), 4).reshape(1, 48)

    return {"w1": w1_win, "b1": b1, "w2": w2_win, "b2": b2,
            "w3": w3_all, "b3": b3, "w4": w4_blk, "b4": b4}


@jax.jit
def autoencoder_forward(packed, x):
    n, c, h, w = x.shape
    assert c == 3 and h % 4 == 0 and w % 4 == 0
    hq, wq = h // 4, w // 4
    r = n * hq * wq

    # Input pack: NCHW -> NHWC, conv padding (+ alignment), space-to-depth x4.
    x_nhwc = jnp.transpose(x, (0, 2, 3, 1))
    x_pad = jnp.pad(x_nhwc, ((0, 0), (1, 3), (1, 3), (0, 0)))
    x_s4 = (x_pad.reshape(n, hq + 1, 4, wq + 1, 4, 3)
            .transpose(0, 1, 3, 2, 4, 5)
            .reshape(n, hq + 1, wq + 1, 48))

    kernel = functools.partial(_autoencoder_kernel, n=n, hq=hq, wq=wq)
    vmem = pl.BlockSpec(memory_space=pltpu.MemorySpace.VMEM)
    enc_flat, dec_flat = pl.pallas_call(
        kernel,
        out_shape=(jax.ShapeDtypeStruct((r, 16), jnp.float32),
                   jax.ShapeDtypeStruct((r, 48), jnp.float32)),
        in_specs=[vmem] * 9,
        out_specs=(vmem, vmem),
        scratch_shapes=[pltpu.VMEM((n, hq + 1, wq + 1, 32), jnp.float32)],
    )(x_s4, packed["w1"], packed["b1"], packed["w2"], packed["b2"],
      packed["w3"], packed["b3"], packed["w4"], packed["b4"])

    # Output unpack (the only per-output layout ops; negligible at this size).
    encode_x = enc_flat.reshape(n, hq, wq, 16).transpose(0, 3, 1, 2)
    decode_x = (dec_flat.reshape(n, hq, wq, 2, 2, 3, 2, 2)   # (n,h2,w2,i,j,co,i2,j2)
                .transpose(0, 5, 1, 3, 6, 2, 4, 7)           # (n,co,h2,i,i2,w2,j,j2)
                .reshape(n, 3, h, w))
    return encode_x, decode_x


# ----------------------------------------------------------------------------
# Parameters (PyTorch layouts) and a pure-XLA reference for verification
# ----------------------------------------------------------------------------
def init_params(key):
    ks = jax.random.split(key, 8)

    def u(k, shape, fan_in):
        bound = 1.0 / (fan_in ** 0.5)
        return jax.random.uniform(k, shape, jnp.float32, -bound, bound)

    return {
        "enc1_w": u(ks[0], (8, 3, 3, 3), 3 * 9),
        "enc1_b": u(ks[1], (8,), 3 * 9),
        "enc2_w": u(ks[2], (16, 8, 3, 3), 8 * 9),
        "enc2_b": u(ks[3], (16,), 8 * 9),
        "dec1_w": u(ks[4], (16, 8, 2, 2), 16 * 4),   # ConvTranspose2d: (Cin, Cout, kh, kw)
        "dec1_b": u(ks[5], (8,), 16 * 4),
        "dec2_w": u(ks[6], (8, 3, 2, 2), 8 * 4),
        "dec2_b": u(ks[7], (3,), 8 * 4),
    }


def reference_forward(params, x):
    """Pure-XLA (no Pallas) reference used to verify the fused kernel."""
    hi = lax.Precision.HIGHEST

    def conv(x, w, b):
        y = lax.conv_general_dilated(
            x, w, window_strides=(2, 2), padding=((1, 1), (1, 1)),
            dimension_numbers=("NCHW", "OIHW", "NCHW"), precision=hi)
        return y + b[None, :, None, None]

    def deconv(x, w, b):
        n, _, hh, ww = x.shape
        co = w.shape[1]
        y = jnp.einsum("nchw,cdij->ndhiwj", x, w,
                       precision=hi).reshape(n, co, 2 * hh, 2 * ww)
        return y + b[None, :, None, None]

    h1 = conv(x, params["enc1_w"], params["enc1_b"])
    enc = conv(h1, params["enc2_w"], params["enc2_b"])
    d1 = deconv(enc, params["dec1_w"], params["dec1_b"])
    dec = jnp.tanh(deconv(d1, params["dec2_w"], params["dec2_b"]))
    return enc, dec


if __name__ == "__main__":
    key = jax.random.PRNGKey(0)
    pkey, xkey = jax.random.split(key)
    params = init_params(pkey)
    packed = pack_params(params)

    # NCHW input, matching nn.Conv2d(3, ...)
    x = jax.random.normal(xkey, (2, 3, 16, 16), dtype=jnp.float32)

    encode_x, decode_x = autoencoder_forward(packed, x)
    jax.block_until_ready((encode_x, decode_x))

    assert encode_x.shape == (2, 16, 4, 4), encode_x.shape
    assert decode_x.shape == (2, 3, 16, 16), decode_x.shape
    assert bool(jnp.all(jnp.isfinite(encode_x)))
    assert bool(jnp.all(jnp.isfinite(decode_x)))
    assert bool(jnp.all(jnp.abs(decode_x) <= 1.0))   # tanh range

    enc_ref, dec_ref = reference_forward(params, x)
    assert bool(jnp.allclose(encode_x, enc_ref, atol=5e-3, rtol=5e-3)), (
        float(jnp.max(jnp.abs(encode_x - enc_ref))))
    assert bool(jnp.allclose(decode_x, dec_ref, atol=5e-3, rtol=5e-3)), (
        float(jnp.max(jnp.abs(decode_x - dec_ref))))

    print("KERNEL_OK")
</pallas_src>

<mosaic_0001>
module attributes {stable_mosaic.version = 11 : i64} {
  func.func @_autoencoder_kernel(%arg0: memref<2x5x5x48xf32, #tpu.memory_space<vmem>>, %arg1: memref<2x2x48x32xf32, #tpu.memory_space<vmem>>, %arg2: memref<1x32xf32, #tpu.memory_space<vmem>>, %arg3: memref<2x2x32x16xf32, #tpu.memory_space<vmem>>, %arg4: memref<1x16xf32, #tpu.memory_space<vmem>>, %arg5: memref<16x32xf32, #tpu.memory_space<vmem>>, %arg6: memref<1x32xf32, #tpu.memory_space<vmem>>, %arg7: memref<32x48xf32, #tpu.memory_space<vmem>>, %arg8: memref<1x48xf32, #tpu.memory_space<vmem>>, %arg9: memref<32x16xf32, #tpu.memory_space<vmem>>, %arg10: memref<32x48xf32, #tpu.memory_space<vmem>>, %arg11: memref<2x5x5x32xf32, #tpu.memory_space<vmem>>) attributes {dimension_semantics = [], scalar_prefetch = 0 : i64, scratch_operands = 1 : i64, tpu.core_type = #tpu.core_type<tc>} {
    %cst = arith.constant 0.000000e+00 : f32
    %0 = vector.broadcast %cst : f32 to vector<2x5x5x32xf32>
    %c0 = arith.constant 0 : index
    %c0_0 = arith.constant 0 : index
    %c0_1 = arith.constant 0 : index
    %c0_2 = arith.constant 0 : index
    %1 = vector.load %arg11[%c0, %c0_0, %c0_1, %c0_2] : memref<2x5x5x32xf32, #tpu.memory_space<vmem>>, vector<2x5x5x32xf32>
    tpu.vector_store %arg11[%c0, %c0_0, %c0_1, %c0_2], %0 {strides = array<i32>} : memref<2x5x5x32xf32, #tpu.memory_space<vmem>>, vector<2x5x5x32xf32>,
    %c0_3 = arith.constant 0 : index
    %c0_4 = arith.constant 0 : index
    %c0_5 = arith.constant 0 : index
    %c0_6 = arith.constant 0 : index
    %2 = vector.load %arg0[%c0_3, %c0_4, %c0_5, %c0_6] : memref<2x5x5x48xf32, #tpu.memory_space<vmem>>, vector<2x4x4x48xf32>
    %3 = vector.shape_cast %2 : vector<2x4x4x48xf32> to vector<32x48xf32>
    %c0_7 = arith.constant 0 : index
    %c0_8 = arith.constant 0 : index
    %c0_9 = arith.constant 0 : index
    %c0_10 = arith.constant 0 : index
    %4 = vector.load %arg1[%c0_7, %c0_8, %c0_9, %c0_10] : memref<2x2x48x32xf32, #tpu.memory_space<vmem>>, vector<1x1x48x32xf32>
    %5 = vector.shape_cast %4 : vector<1x1x48x32xf32> to vector<48x32xf32>
    %cst_11 = arith.constant dense<0.000000e+00> : vector<32x32xf32>
    %6 = tpu.matmul %3, %5, %cst_11 {dimension_numbers = #tpu.dot_dimension_numbers<[1], [0], [0], [1], [0, 0, 1, 1], [], []>} : vector<32x48xf32>, vector<48x32xf32>, vector<32x32xf32> -> vector<32x32xf32>
    %c0_12 = arith.constant 0 : index
    %c0_13 = arith.constant 0 : index
    %c1 = arith.constant 1 : index
    %c0_14 = arith.constant 0 : index
    %7 = vector.load %arg0[%c0_12, %c0_13, %c1, %c0_14] : memref<2x5x5x48xf32, #tpu.memory_space<vmem>>, vector<2x4x4x48xf32>
    %8 = vector.shape_cast %7 : vector<2x4x4x48xf32> to vector<32x48xf32>
    %c0_15 = arith.constant 0 : index
    %c1_16 = arith.constant 1 : index
    %c0_17 = arith.constant 0 : index
    %c0_18 = arith.constant 0 : index
    %9 = vector.load %arg1[%c0_15, %c1_16, %c0_17, %c0_18] : memref<2x2x48x32xf32, #tpu.memory_space<vmem>>, vector<1x1x48x32xf32>
    %10 = vector.shape_cast %9 : vector<1x1x48x32xf32> to vector<48x32xf32>
    %cst_19 = arith.constant dense<0.000000e+00> : vector<32x32xf32>
    %11 = tpu.matmul %8, %10, %cst_19 {dimension_numbers = #tpu.dot_dimension_numbers<[1], [0], [0], [1], [0, 0, 1, 1], [], []>} : vector<32x48xf32>, vector<48x32xf32>, vector<32x32xf32> -> vector<32x32xf32>
    %12 = arith.addf %6, %11 : vector<32x32xf32>
    %c0_20 = arith.constant 0 : index
    %c1_21 = arith.constant 1 : index
    %c0_22 = arith.constant 0 : index
    %c0_23 = arith.constant 0 : index
    %13 = vector.load %arg0[%c0_20, %c1_21, %c0_22, %c0_23] : memref<2x5x5x48xf32, #tpu.memory_space<vmem>>, vector<2x4x4x48xf32>
    %14 = vector.shape_cast %13 : vector<2x4x4x48xf32> to vector<32x48xf32>
    %c1_24 = arith.constant 1 : index
    %c0_25 = arith.constant 0 : index
    %c0_26 = arith.constant 0 : index
    %c0_27 = arith.constant 0 : index
    %15 = vector.load %arg1[%c1_24, %c0_25, %c0_26, %c0_27] : memref<2x2x48x32xf32, #tpu.memory_space<vmem>>, vector<1x1x48x32xf32>
    %16 = vector.shape_cast %15 : vector<1x1x48x32xf32> to vector<48x32xf32>
    %cst_28 = arith.constant dense<0.000000e+00> : vector<32x32xf32>
    %17 = tpu.matmul %14, %16, %cst_28 {dimension_numbers = #tpu.dot_dimension_numbers<[1], [0], [0], [1], [0, 0, 1, 1], [], []>} : vector<32x48xf32>, vector<48x32xf32>, vector<32x32xf32> -> vector<32x32xf32>
    %18 = arith.addf %12, %17 : vector<32x32xf32>
    %c0_29 = arith.constant 0 : index
    %c1_30 = arith.constant 1 : index
    %c1_31 = arith.constant 1 : index
    %c0_32 = arith.constant 0 : index
    %19 = vector.load %arg0[%c0_29, %c1_30, %c1_31, %c0_32] : memref<2x5x5x48xf32, #tpu.memory_space<vmem>>, vector<2x4x4x48xf32>
    %20 = vector.shape_cast %19 : vector<2x4x4x48xf32> to vector<32x48xf32>
    %c1_33 = arith.constant 1 : index
    %c1_34 = arith.constant 1 : index
    %c0_35 = arith.constant 0 : index
    %c0_36 = arith.constant 0 : index
    %21 = vector.load %arg1[%c1_33, %c1_34, %c0_35, %c0_36] : memref<2x2x48x32xf32, #tpu.memory_space<vmem>>, vector<1x1x48x32xf32>
    %22 = vector.shape_cast %21 : vector<1x1x48x32xf32> to vector<48x32xf32>
    %cst_37 = arith.constant dense<0.000000e+00> : vector<32x32xf32>
    %23 = tpu.matmul %20, %22, %cst_37 {dimension_numbers = #tpu.dot_dimension_numbers<[1], [0], [0], [1], [0, 0, 1, 1], [], []>} : vector<32x48xf32>, vector<48x32xf32>, vector<32x32xf32> -> vector<32x32xf32>
    %24 = arith.addf %18, %23 : vector<32x32xf32>
    %c0_38 = arith.constant 0 : index
    %c0_39 = arith.constant 0 : index
    %25 = vector.load %arg2[%c0_38, %c0_39] : memref<1x32xf32, #tpu.memory_space<vmem>>, vector<1x32xf32>
    %26 = vector.broadcast %25 : vector<1x32xf32> to vector<32x32xf32>
    %27 = arith.addf %24, %26 : vector<32x32xf32>
    %28 = vector.extract_strided_slice %27 {offsets = [0, 0], sizes = [32, 8], strides = [1, 1]} : vector<32x32xf32> to vector<32x8xf32>
    %29 = vector.shape_cast %28 : vector<32x8xf32> to vector<2x4x4x8xf32>
    %c0_40 = arith.constant 0 : index
    %c0_41 = arith.constant 0 : index
    %c0_42 = arith.constant 0 : index
    %c24 = arith.constant 24 : index
    %30 = vector.load %arg11[%c0_40, %c0_41, %c0_42, %c24] : memref<2x5x5x32xf32, #tpu.memory_space<vmem>>, vector<2x4x4x8xf32>
    tpu.vector_store %arg11[%c0_40, %c0_41, %c0_42, %c24], %29 {strides = array<i32>} : memref<2x5x5x32xf32, #tpu.memory_space<vmem>>, vector<2x4x4x8xf32>,
    %31 = vector.extract_strided_slice %27 {offsets = [0, 8], sizes = [32, 8], strides = [1, 1]} : vector<32x32xf32> to vector<32x8xf32>
    %32 = vector.shape_cast %31 : vector<32x8xf32> to vector<2x4x4x8xf32>
    %c0_43 = arith.constant 0 : index
    %c0_44 = arith.constant 0 : index
    %c1_45 = arith.constant 1 : index
    %c16 = arith.constant 16 : index
    %33 = vector.load %arg11[%c0_43, %c0_44, %c1_45, %c16] : memref<2x5x5x32xf32, #tpu.memory_space<vmem>>, vector<2x4x4x8xf32>
    tpu.vector_store %arg11[%c0_43, %c0_44, %c1_45, %c16], %32 {strides = array<i32>} : memref<2x5x5x32xf32, #tpu.memory_space<vmem>>, vector<2x4x4x8xf32>,
    %34 = vector.extract_strided_slice %27 {offsets = [0, 16], sizes = [32, 8], strides = [1, 1]} : vector<32x32xf32> to vector<32x8xf32>
    %35 = vector.shape_cast %34 : vector<32x8xf32> to vector<2x4x4x8xf32>
    %c0_46 = arith.constant 0 : index
    %c1_47 = arith.constant 1 : index
    %c0_48 = arith.constant 0 : index
    %c8 = arith.constant 8 : index
    %36 = vector.load %arg11[%c0_46, %c1_47, %c0_48, %c8] : memref<2x5x5x32xf32, #tpu.memory_space<vmem>>, vector<2x4x4x8xf32>
    tpu.vector_store %arg11[%c0_46, %c1_47, %c0_48, %c8], %35 {strides = array<i32>} : memref<2x5x5x32xf32, #tpu.memory_space<vmem>>, vector<2x4x4x8xf32>,
    %37 = vector.extract_strided_slice %27 {offsets = [0, 24], sizes = [32, 8], strides = [1, 1]} : vector<32x32xf32> to vector<32x8xf32>
    %38 = vector.shape_cast %37 : vector<32x8xf32> to vector<2x4x4x8xf32>
    %c0_49 = arith.constant 0 : index
    %c1_50 = arith.constant 1 : index
    %c1_51 = arith.constant 1 : index
    %c0_52 = arith.constant 0 : index
    %39 = vector.load %arg11[%c0_49, %c1_50, %c1_51, %c0_52] : memref<2x5x5x32xf32, #tpu.memory_space<vmem>>, vector<2x4x4x8xf32>
    tpu.vector_store %arg11[%c0_49, %c1_50, %c1_51, %c0_52], %38 {strides = array<i32>} : memref<2x5x5x32xf32, #tpu.memory_space<vmem>>, vector<2x4x4x8xf32>,
    %c0_53 = arith.constant 0 : index
    %c0_54 = arith.constant 0 : index
    %c0_55 = arith.constant 0 : index
    %c0_56 = arith.constant 0 : index
    %40 = vector.load %arg11[%c0_53, %c0_54, %c0_55, %c0_56] : memref<2x5x5x32xf32, #tpu.memory_space<vmem>>, vector<2x4x4x32xf32>
    %41 = vector.shape_cast %40 : vector<2x4x4x32xf32> to vector<32x32xf32>
    %c0_57 = arith.constant 0 : index
    %c0_58 = arith.constant 0 : index
    %c0_59 = arith.constant 0 : index
    %c0_60 = arith.constant 0 : index
    %42 = vector.load %arg3[%c0_57, %c0_58, %c0_59, %c0_60] : memref<2x2x32x16xf32, #tpu.memory_space<vmem>>, vector<1x1x32x16xf32>
    %43 = vector.shape_cast %42 : vector<1x1x32x16xf32> to vector<32x16xf32>
    %cst_61 = arith.constant dense<0.000000e+00> : vector<32x16xf32>
    %44 = tpu.matmul %41, %43, %cst_61 {dimension_numbers = #tpu.dot_dimension_numbers<[1], [0], [0], [1], [0, 0, 1, 1], [], []>} : vector<32x32xf32>, vector<32x16xf32>, vector<32x16xf32> -> vector<32x16xf32>
    %c0_62 = arith.constant 0 : index
    %c0_63 = arith.constant 0 : index
    %c1_64 = arith.constant 1 : index
    %c0_65 = arith.constant 0 : index
    %45 = vector.load %arg11[%c0_62, %c0_63, %c1_64, %c0_65] : memref<2x5x5x32xf32, #tpu.memory_space<vmem>>, vector<2x4x4x32xf32>
    %46 = vector.shape_cast %45 : vector<2x4x4x32xf32> to vector<32x32xf32>
    %c0_66 = arith.constant 0 : index
    %c1_67 = arith.constant 1 : index
    %c0_68 = arith.constant 0 : index
    %c0_69 = arith.constant 0 : index
    %47 = vector.load %arg3[%c0_66, %c1_67, %c0_68, %c0_69] : memref<2x2x32x16xf32, #tpu.memory_space<vmem>>, vector<1x1x32x16xf32>
    %48 = vector.shape_cast %47 : vector<1x1x32x16xf32> to vector<32x16xf32>
    %cst_70 = arith.constant dense<0.000000e+00> : vector<32x16xf32>
    %49 = tpu.matmul %46, %48, %cst_70 {dimension_numbers = #tpu.dot_dimension_numbers<[1], [0], [0], [1], [0, 0, 1, 1], [], []>} : vector<32x32xf32>, vector<32x16xf32>, vector<32x16xf32> -> vector<32x16xf32>
    %50 = arith.addf %44, %49 : vector<32x16xf32>
    %c0_71 = arith.constant 0 : index
    %c1_72 = arith.constant 1 : index
    %c0_73 = arith.constant 0 : index
    %c0_74 = arith.constant 0 : index
    %51 = vector.load %arg11[%c0_71, %c1_72, %c0_73, %c0_74] : memref<2x5x5x32xf32, #tpu.memory_space<vmem>>, vector<2x4x4x32xf32>
    %52 = vector.shape_cast %51 : vector<2x4x4x32xf32> to vector<32x32xf32>
    %c1_75 = arith.constant 1 : index
    %c0_76 = arith.constant 0 : index
    %c0_77 = arith.constant 0 : index
    %c0_78 = arith.constant 0 : index
    %53 = vector.load %arg3[%c1_75, %c0_76, %c0_77, %c0_78] : memref<2x2x32x16xf32, #tpu.memory_space<vmem>>, vector<1x1x32x16xf32>
    %54 = vector.shape_cast %53 : vector<1x1x32x16xf32> to vector<32x16xf32>
    %cst_79 = arith.constant dense<0.000000e+00> : vector<32x16xf32>
    %55 = tpu.matmul %52, %54, %cst_79 {dimension_numbers = #tpu.dot_dimension_numbers<[1], [0], [0], [1], [0, 0, 1, 1], [], []>} : vector<32x32xf32>, vector<32x16xf32>, vector<32x16xf32> -> vector<32x16xf32>
    %56 = arith.addf %50, %55 : vector<32x16xf32>
    %c0_80 = arith.constant 0 : index
    %c1_81 = arith.constant 1 : index
    %c1_82 = arith.constant 1 : index
    %c0_83 = arith.constant 0 : index
    %57 = vector.load %arg11[%c0_80, %c1_81, %c1_82, %c0_83] : memref<2x5x5x32xf32, #tpu.memory_space<vmem>>, vector<2x4x4x32xf32>
    %58 = vector.shape_cast %57 : vector<2x4x4x32xf32> to vector<32x32xf32>
    %c1_84 = arith.constant 1 : index
    %c1_85 = arith.constant 1 : index
    %c0_86 = arith.constant 0 : index
    %c0_87 = arith.constant 0 : index
    %59 = vector.load %arg3[%c1_84, %c1_85, %c0_86, %c0_87] : memref<2x2x32x16xf32, #tpu.memory_space<vmem>>, vector<1x1x32x16xf32>
    %60 = vector.shape_cast %59 : vector<1x1x32x16xf32> to vector<32x16xf32>
    %cst_88 = arith.constant dense<0.000000e+00> : vector<32x16xf32>
    %61 = tpu.matmul %58, %60, %cst_88 {dimension_numbers = #tpu.dot_dimension_numbers<[1], [0], [0], [1], [0, 0, 1, 1], [], []>} : vector<32x32xf32>, vector<32x16xf32>, vector<32x16xf32> -> vector<32x16xf32>
    %62 = arith.addf %56, %61 : vector<32x16xf32>
    %c0_89 = arith.constant 0 : index
    %c0_90 = arith.constant 0 : index
    %63 = vector.load %arg4[%c0_89, %c0_90] : memref<1x16xf32, #tpu.memory_space<vmem>>, vector<1x16xf32>
    %64 = vector.broadcast %63 : vector<1x16xf32> to vector<32x16xf32>
    %65 = arith.addf %62, %64 : vector<32x16xf32>
    %c0_91 = arith.constant 0 : index
    %c0_92 = arith.constant 0 : index
    %66 = vector.load %arg9[%c0_91, %c0_92] : memref<32x16xf32, #tpu.memory_space<vmem>>, vector<32x16xf32>
    tpu.vector_store %arg9[%c0_91, %c0_92], %65 {strides = array<i32>} : memref<32x16xf32, #tpu.memory_space<vmem>>, vector<32x16xf32>,
    %c0_93 = arith.constant 0 : index
    %c0_94 = arith.constant 0 : index
    %67 = vector.load %arg5[%c0_93, %c0_94] : memref<16x32xf32, #tpu.memory_space<vmem>>, vector<16x32xf32>
    %cst_95 = arith.constant dense<0.000000e+00> : vector<32x32xf32>
    %68 = tpu.matmul %65, %67, %cst_95 {dimension_numbers = #tpu.dot_dimension_numbers<[1], [0], [0], [1], [0, 0, 1, 1], [], []>} : vector<32x16xf32>, vector<16x32xf32>, vector<32x32xf32> -> vector<32x32xf32>
    %c0_96 = arith.constant 0 : index
    %c0_97 = arith.constant 0 : index
    %69 = vector.load %arg6[%c0_96, %c0_97] : memref<1x32xf32, #tpu.memory_space<vmem>>, vector<1x32xf32>
    %70 = vector.broadcast %69 : vector<1x32xf32> to vector<32x32xf32>
    %71 = arith.addf %68, %70 : vector<32x32xf32>
    %c0_98 = arith.constant 0 : index
    %c0_99 = arith.constant 0 : index
    %72 = vector.load %arg7[%c0_98, %c0_99] : memref<32x48xf32, #tpu.memory_space<vmem>>, vector<32x48xf32>
    %cst_100 = arith.constant dense<0.000000e+00> : vector<32x48xf32>
    %73 = tpu.matmul %71, %72, %cst_100 {dimension_numbers = #tpu.dot_dimension_numbers<[1], [0], [0], [1], [0, 0, 1, 1], [], []>} : vector<32x32xf32>, vector<32x48xf32>, vector<32x48xf32> -> vector<32x48xf32>
    %c0_101 = arith.constant 0 : index
    %c0_102 = arith.constant 0 : index
    %74 = vector.load %arg8[%c0_101, %c0_102] : memref<1x48xf32, #tpu.memory_space<vmem>>, vector<1x48xf32>
    %75 = vector.broadcast %74 : vector<1x48xf32> to vector<32x48xf32>
    %76 = arith.addf %73, %75 : vector<32x48xf32>
    %77 = math.tanh %76 : vector<32x48xf32>
    %c0_103 = arith.constant 0 : index
    %c0_104 = arith.constant 0 : index
    %78 = vector.load %arg10[%c0_103, %c0_104] : memref<32x48xf32, #tpu.memory_space<vmem>>, vector<32x48xf32>
    tpu.vector_store %arg10[%c0_103, %c0_104], %77 {strides = array<i32>} : memref<32x48xf32, #tpu.memory_space<vmem>>, vector<32x48xf32>,
    return
  }
}

</mosaic_0001>

<bundles_post_ra>
// kernel: autoencoder_forward.1
= control target key start
LH: loop header
LB: loop body
LE: loop exit
PB: predicated region body
PF: predicated region fallthrough
CT: control target
= control target key end

     0   :  { %vm87_vm0 = vcmask 392192   ;;  %s2341_s0 = inlined_call_operand.vmem [shape: f32[2,5,5,48], index: 0, kind: input, shape index: {}]   ;;  %s2342_s1 = inlined_call_operand.vmem [shape: f32[2,2,48,32], index: 1, kind: input, shape index: {}]   ;;  %s2343_s2 = inlined_call_operand.vmem [shape: f32[1,32], index: 2, kind: input, shape index: {}]   ;;  %s2344_s3 = inlined_call_operand.vmem [shape: f32[2,2,32,16], index: 3, kind: input, shape index: {}]   ;;  %s2345_s4 = inlined_call_operand.vmem [shape: f32[1,16], index: 4, kind: input, shape index: {}]   ;;  %s2346_s5 = inlined_call_operand.vmem [shape: f32[16,32], index: 5, kind: input, shape index: {}]   ;;  %s2347_s6 = inlined_call_operand.vmem [shape: f32[1,32], index: 6, kind: input, shape index: {}]   ;;  %s2348_s7 = inlined_call_operand.vmem [shape: f32[32,48], index: 7, kind: input, shape index: {}]   ;;  %s2349_s8 = inlined_call_operand.vmem [shape: f32[1,48], index: 8, kind: input, shape index: {}]   ;;  %s2350_s9 = inlined_call_operand.hbm [shape: f32[32,16], index: 9, kind: output, shape index: {0}]   ;;  %s2351_s10 = inlined_call_operand.vmem [shape: f32[32,48], index: 10, kind: output, shape index: {1}]  }
   0x1   :  { %v1425_v0 = vld [vmem:[%s2342_s1 + $0x30] sm:$0xff]  ;;  %v1426_v1 = vld [vmem:[%s2342_s1 + $0x38] sm:$0xff]  ;;  %v1427_v2 = vld [vmem:[%s2342_s1 + $0x40] sm:$0xff] }
   0x2   :  { %v1753_v3 = vpack.c.bf16 %v1426_v1, %v1425_v0  ;;  %v1428_v4 = vld [vmem:[%s2342_s1 + $0x48] sm:$0xff]  ;;  %v1429_v5 = vld [vmem:[%s2342_s1 + $0x50] sm:$0xff]  ;;  %v1430_v6 = vld [vmem:[%s2342_s1 + $0x58] sm:$0xff] }
   0x3   :  { %v1757_v7 = vpack.c.bf16 %v1428_v4, %v1427_v2  ;;  %v1876_v8 = vld [vmem:[%s2341_s0 + $0x1] ss:$8 sps:$4 sm:$0xff]   ;;  %v1761_v9 = vpack.c.bf16 %v1430_v6, %v1429_v5  ;;  %v56_v13 = vld [vmem:[%s2342_s1 + $0x10] sm:$0xff]  ;;  %v57_v14 = vld [vmem:[%s2342_s1 + $0x18] sm:$0xff] }
   0x4   :  { %1754 = vmatprep.subr.bf16.mxu0 %v1753_v3  ;;  %1613 = vmatprep.mubr.msk.f32.mxu0 %vm87_vm0, %v1876_v8  ;;  %v54_v10 = vld [vmem:[%s2342_s1] sm:$0xff]  ;;  %v55_v11 = vld [vmem:[%s2342_s1 + $0x8] sm:$0xff]  ;;  %v1877_v15 = vld [vmem:[%s2341_s0 + $0x11] ss:$8 sps:$4 sm:$0xff]   ;;  %v1769_v17 = vpack.c.bf16 %v57_v14, %v56_v13 }
   0x5   :  { %1756 = vmatpush3.bf16.msra.mxu0 %v1753_v3  ;;  %v1765_v12 = vpack.c.bf16 %v55_v11, %v54_v10  ;;  %v1878_v16 = vld [vmem:[%s2341_s0 + $0x29] ss:$8 sps:$4 sm:$0xff]   ;;  %v58_v18 = vld [vmem:[%s2342_s1 + $0x20] sm:$0xff]  ;;  %v1450_v27 = vld [vmem:[%s2342_s1 + $0x78] sm:$0xff] }
   0x6   :  { %1758 = vmatprep.subr.bf16.mxu0 %v1757_v7  ;;  %v59_v19 = vld [vmem:[%s2342_s1 + $0x28] sm:$0xff]  ;;  %v1879_v20 = vld [vmem:[%s2341_s0 + $0x39] ss:$8 sps:$4 sm:$0xff]   ;;  %v1449_v26 = vld [vmem:[%s2342_s1 + $0x70] sm:$0xff] }
   0x7   :  { %v1880_v21 = vld [vmem:[%s2341_s0] ss:$8 sps:$4 sm:$0xff]   ;;  %v1773_v22 = vpack.c.bf16 %v59_v19, %v58_v18  ;;  %v1881_v28 = vld [vmem:[%s2341_s0 + $0x10] ss:$8 sps:$4 sm:$0xff]  }
   0x8   :  { %v1447_v23 = vld [vmem:[%s2342_s1 + $0x60] sm:$0xff]  ;;  %v1448_v24 = vld [vmem:[%s2342_s1 + $0x68] sm:$0xff] }
   0x9   :  { %1760 = vmatpush3.bf16.msra.mxu0 %v1757_v7  ;;  %v1777_v25 = vpack.c.bf16 %v1448_v24, %v1447_v23  ;;  %v1882_v29 = vld [vmem:[%s2341_s0 + $0x28] ss:$8 sps:$4 sm:$0xff]  }
   0xa   :  { %1762 = vmatprep.subr.bf16.mxu0 %v1761_v9 }
   0xd   :  { %1764 = vmatpush3.bf16.msra.mxu0 %v1761_v9 }
   0xe   :  { %1766 = vmatprep.subr.bf16.mxu0 %v1765_v12 }
  0x10   :  { %1614 = vmatmul.mubr.msk.f32.vlgmr.msra.gmra.mrb[0].mxu0 %vm87_vm0, %v1877_v15 }
  0x11   :  { %1768 = vmatpush3.bf16.msra.mxu0 %v1765_v12  ;;  %1616 = vmatprep.mubr.msk.f32.mxu0 %vm87_vm0, %v1878_v16 }
  0x12   :  { %1770 = vmatprep.subr.bf16.mxu0 %v1769_v17 }
  0x14   :  { %1617 = vmatmul.mubr.msk.f32.gmra.mrb[2].mxu0 %vm87_vm0, %v1879_v20 }
  0x15   :  { %1772 = vmatpush3.bf16.msra.mxu0 %v1769_v17  ;;  %1631 = vmatprep.mubr.msk.f32.mxu0 %vm87_vm0, %v1880_v21 }
  0x16   :  { %1774 = vmatprep.subr.bf16.mxu0 %v1773_v22 }
  0x19   :  { %1776 = vmatpush3.bf16.msra.mxu0 %v1773_v22 }
  0x1a   :  { %16 = vsyncpa [#allocation4], 0  ;;  %1778 = vmatprep.subr.bf16.mxu0 %v1777_v25  ;;  %v1781_v30 = vpack.c.bf16 %v1450_v27, %v1449_v26  ;;  %v1451_v31 = vld [vmem:[%s2342_s1 + $0x80] sm:$0xff]  ;;  %v1452_v32 = vld [vmem:[%s2342_s1 + $0x88] sm:$0xff]  ;;  %vm35_vm1 = vcmask 258048   ;;  %v1940_v52 = vmov 0.0  }
  0x1b   :  { %v1883_v33 = vld [vmem:[%s2341_s0 + $0x38] ss:$8 sps:$4 sm:$0xff]   ;;  %v1884_v34 = vld [vmem:[%s2341_s0 + $0x8] ss:$8 sps:$4 sm:$0xff]   ;;  %v1785_v35 = vpack.c.bf16 %v1452_v32, %v1451_v31  ;;  %38 = vst.msk [vmem:[#allocation2 + $0x10] sm:$0x1f] %vm35_vm1, %v1940_v52 }
  0x1c   :  { %1632 = vmatmul.mubr.msk.f32.vlgmr.msra.gmra.mrb[0].mxu0 %vm87_vm0, %v1881_v28  ;;  %v1465_v36 = vld [vmem:[%s2342_s1 + $0x90] sm:$0xff]  ;;  %v1466_v37 = vld [vmem:[%s2342_s1 + $0x98] sm:$0xff]  ;;  %v1467_v39 = vld [vmem:[%s2342_s1 + $0xa0] sm:$0xff]  ;;  %36 = vst.msk [vmem:[#allocation2] sm:$0x1f] %vm35_vm1, %v1940_v52  ;;  %s1942_s14 = smov 24  }
  0x1d   :  { %1780 = vmatpush3.bf16.msra.mxu0 %v1777_v25  ;;  %1634 = vmatprep.mubr.msk.f32.mxu0 %vm87_vm0, %v1882_v29  ;;  %v1789_v38 = vpack.c.bf16 %v1466_v37, %v1465_v36  ;;  %v1468_v40 = vld [vmem:[%s2342_s1 + $0xa8] sm:$0xff]  ;;  %v1885_v41 = vld [vmem:[%s2341_s0 + $0x18] ss:$8 sps:$4 sm:$0xff]   ;;  %v1469_v44 = vld [vmem:[%s2342_s1 + $0xb0] sm:$0xff]  ;;  %37 = vst.msk [vmem:[#allocation2 + $0x8] sm:$0x1f] %vm35_vm1, %v1940_v52 }
  0x1e   :  { %1782 = vmatprep.subr.bf16.mxu0 %v1781_v30  ;;  %v1886_v42 = vld [vmem:[%s2341_s0 + $0x30] ss:$8 sps:$4 sm:$0xff]   ;;  %v1793_v43 = vpack.c.bf16 %v1468_v40, %v1467_v39  ;;  %v1887_v46 = vld [vmem:[%s2341_s0 + $0x40] ss:$8 sps:$4 sm:$0xff]   ;;  %39 = vst.msk [vmem:[#allocation2 + $0x18] sm:$0x1f] %vm35_vm1, %v1940_v52 }
  0x1f   :  { %v1470_v45 = vld [vmem:[%s2342_s1 + $0xb8] sm:$0xff]  ;;  %v1888_v47 = vld [vmem:[%s2341_s0 + $0x9] ss:$8 sps:$4 sm:$0xff]   ;;  %40 = vst.msk [vmem:[#allocation2 + $0x20] sm:$0x1f] %vm35_vm1, %v1940_v52  ;;  %s1943_s15 = smov 120  }
  0x20   :  { %1635 = vmatmul.mubr.msk.f32.gmra.mrb[2].mxu0 %vm87_vm0, %v1883_v33  ;;  %v1797_v48 = vpack.c.bf16 %v1470_v45, %v1469_v44  ;;  %v1889_v49 = vld [vmem:[%s2341_s0 + $0x19] ss:$8 sps:$4 sm:$0xff]   ;;  %41 = vst.msk [vmem:[#allocation2 + $0x28] sm:$0x1f] %vm35_vm1, %v1940_v52  ;;  %42 = vst.msk [vmem:[#allocation2 + $0x30] sm:$0x1f] %vm35_vm1, %v1940_v52 }
  0x21   :  { %1784 = vmatpush3.bf16.msra.mxu0 %v1781_v30  ;;  %1649 = vmatprep.mubr.msk.f32.mxu0 %vm87_vm0, %v1884_v34  ;;  %v1890_v50 = vld [vmem:[%s2341_s0 + $0x31] ss:$8 sps:$4 sm:$0xff]   ;;  %v1891_v51 = vld [vmem:[%s2341_s0 + $0x41] ss:$8 sps:$4 sm:$0xff]   ;;  %43 = vst.msk [vmem:[#allocation2 + $0x38] sm:$0x1f] %vm35_vm1, %v1940_v52 }
  0x22   :  { %1786 = vmatprep.subr.bf16.mxu0 %v1785_v35  ;;  %44 = vst.msk [vmem:[#allocation2 + $0x40] sm:$0x1f] %vm35_vm1, %v1940_v52  ;;  %45 = vst.msk [vmem:[#allocation2 + $0x48] sm:$0x1f] %vm35_vm1, %v1940_v52  ;;  %v1475_v53 = vld [vmem:[%s2343_s2] ss:$0 sm:$0xff] }
  0x23   :  { %s1941_s0 = smov 8   ;;  %s1944_s16 = smov 104   ;;  %v1476_v61 = vld [vmem:[%s2344_s3 + $0x20] sm:$0xff]  ;;  %v1477_v62 = vld [vmem:[%s2344_s3 + $0x28] sm:$0xff]  ;;  %v1478_v1 = vld [vmem:[%s2344_s3 + $0x30] sm:$0xff]  ;;  %vm578_vm2 = vcmask 257216  }
  0x24   :  { %v1801_v0 = vpack.c.bf16 %v1477_v62, %v1476_v61  ;;  %v1479_v2 = vld [vmem:[%s2344_s3 + $0x38] sm:$0xff]  ;;  %v695_v7 = vld [vmem:[%s2344_s3] sm:$0xff]  ;;  %v696_v8 = vld [vmem:[%s2344_s3 + $0x8] sm:$0xff]  ;;  %vm611_vm3 = vcmask 191616   ;;  %vm645_vm4 = vcmask 126016   ;;  %vm678_vm5 = vcmask 60416  }
  0x25   :  { %1788 = vmatpush3.bf16.msra.mxu0 %v1785_v35  ;;  %v1805_v3 = vpack.c.bf16 %v1479_v2, %v1478_v1  ;;  %v2181_v10 = vpack.c.bf16 %v696_v8, %v695_v7  ;;  %v697_v29 = vld [vmem:[%s2344_s3 + $0x10] sm:$0xff]  ;;  %v698_v30 = vld [vmem:[%s2344_s3 + $0x18] sm:$0xff]  ;;  %vm724_vm6 = vcmask 261120   ;;  %v1488_v36 = vld [vmem:[%s2344_s3 + $0x40] sm:$0xff]  ;;  %vm1178_vm7 = vcmask 130048  }
  0x26   :  { %1790 = vmatprep.subr.bf16.mxu0 %v1789_v38  ;;  %1802 = vmatprep.subr.bf16.mxu1 %v1801_v0  ;;  %v1813_v35 = vpack.c.bf16 %v698_v30, %v697_v29  ;;  %v1489_v37 = vld [vmem:[%s2344_s3 + $0x48] sm:$0xff] }
  0x27   :  { %1804 = vmatpush3.bf16.msra.mxu1 %v1801_v0  ;;  %v1817_v40 = vpack.c.bf16 %v1489_v37, %v1488_v36  ;;  %v1499_v0 = vld [vmem:[%s2344_s3 + $0x78] sm:$0xff] }
  0x28   :  { %1650 = vmatmul.mubr.msk.f32.vlgmr.msra.gmra.mrb[0].mxu0 %vm87_vm0, %v1885_v41  ;;  %1806 = vmatprep.subr.bf16.mxu1 %v1805_v3 }
  0x29   :  { %1792 = vmatpush3.bf16.msra.mxu0 %v1789_v38  ;;  %1652 = vmatprep.mubr.msk.f32.mxu0 %vm87_vm0, %v1886_v42 }
  0x2a   :  { %1794 = vmatprep.subr.bf16.mxu0 %v1793_v43 }
  0x2b   :  { %1808 = vmatpush3.bf16.msra.mxu1 %v1805_v3 }
  0x2c   :  { %1653 = vmatmul.mubr.msk.f32.gmra.mrb[2].mxu0 %vm87_vm0, %v1887_v46  ;;  %1810 = vmatprep.subr.bf16.mxu1 %v2181_v10 }
  0x2d   :  { %1796 = vmatpush3.bf16.msra.mxu0 %v1793_v43  ;;  %1667 = vmatprep.mubr.msk.f32.mxu0 %vm87_vm0, %v1888_v47 }
  0x2e   :  { %1798 = vmatprep.subr.bf16.mxu0 %v1797_v48 }
  0x31   :  { %1800 = vmatpush3.bf16.msra.mxu0 %v1797_v48 }
  0x34   :  { %1668 = vmatmul.mubr.msk.f32.vlgmr.msra.gmra.mrb[0].mxu0 %vm87_vm0, %v1889_v49 }
  0x35   :  { %1670 = vmatprep.mubr.msk.f32.mxu0 %vm87_vm0, %v1890_v50  ;;  %v1490_v50 = vld [vmem:[%s2344_s3 + $0x50] sm:$0xff] }
  0x38   :  { %1671 = vmatmul.mubr.msk.f32.gmra.mrb[2].mxu0 %vm87_vm0, %v1891_v51  ;;  %v1491_v51 = vld [vmem:[%s2344_s3 + $0x58] sm:$0xff] }
 0x107   :  { %v1669_v54 = vpop.f32.mrb[0].mxu0 }
 0x108   :  { %v543_v55 = vadd.f32 %v1669_v54, %v1475_v53  ;;  %v512_v56 = vpop.f32.mrb[1].mxu0 }
 0x109   :  { %v542_v58 = vadd.f32 %v1475_v53, %v512_v56  ;;  %v1496_v56 = vld [vmem:[%s2344_s3 + $0x60] sm:$0xff] }
 0x10a   :  { %591 = vrot.lane.b32.xlu1 %v543_v55, %s1941_s0  ;;  %558 = vrot.lane.b32.xlu0 %v543_v55, %s1942_s14  ;;  %v551_v60 = vcombine.high %v543_v55, %v543_v55 }
 0x10b   :  { %v1672_v57 = vpop.f32.mrb[2].mxu0  ;;  %v550_v63 = vcombine.high %v542_v58, %v542_v58 }
 0x10c   :  { %v522_v59 = vpop.f32.mrb[3].mxu0  ;;  %v545_v4 = vadd.f32 %v1672_v57, %v1475_v53  ;;  %v1497_v57 = vld [vmem:[%s2344_s3 + $0x68] sm:$0xff] }
 0x10d   :  { %v544_v5 = vadd.f32 %v1475_v53, %v522_v59  ;;  %v1821_v59 = vpack.c.bf16 %v1491_v51, %v1490_v50  ;;  %v1825_v62 = vpack.c.bf16 %v1497_v57, %v1496_v56 }
 0x10e   :  { %624 = vrot.lane.b32.xlu0 %v543_v55, %s1943_s15  ;;  %620 = vrot.lane.b32.xlu1 %v542_v58, %s1943_s15  ;;  %v553_v6 = vcombine.high %v545_v4, %v545_v4 }
 0x10f   :  { %v552_v9 = vcombine.high %v544_v5, %v544_v5 }
 0x112   :  { %658 = vrot.lane.b32.xlu0 %v543_v55, %s1944_s16  ;;  %654 = vrot.lane.b32.xlu1 %v542_v58, %s1944_s16 }
 0x116   :  { %560 = vrot.lane.b32.xlu1 %v551_v60, %s1942_s14  ;;  %554 = vrot.lane.b32.xlu0 %v542_v58, %s1942_s14 }
 0x11a   :  { %587 = vrot.lane.b32.xlu0 %v542_v58, %s1941_s0  ;;  %589 = vrot.lane.b32.xlu1 %v550_v63, %s1941_s0 }
 0x11e   :  { %593 = vrot.lane.b32.xlu0 %v551_v60, %s1941_s0  ;;  %622 = vrot.lane.b32.xlu1 %v550_v63, %s1943_s15 }
 0x122   :  { %656 = vrot.lane.b32.xlu1 %v550_v63, %s1944_s16  ;;  %556 = vrot.lane.b32.xlu0 %v550_v63, %s1942_s14  ;;  %v1498_v63 = vld [vmem:[%s2344_s3 + $0x70] sm:$0xff] }
 0x123   :  { %v1829_v3 = vpack.c.bf16 %v1499_v0, %v1498_v63 }
 0x126   :  { %632 = vrot.lane.b32.xlu0 %v545_v4, %s1943_s15  ;;  %566 = vrot.lane.b32.xlu1 %v545_v4, %s1942_s14 }
 0x12a   :  { %599 = vrot.lane.b32.xlu1 %v545_v4, %s1941_s0  ;;  %562 = vrot.lane.b32.xlu0 %v544_v5, %s1942_s14 }
 0x12e   :  { %628 = vrot.lane.b32.xlu1 %v544_v5, %s1943_s15  ;;  %595 = vrot.lane.b32.xlu0 %v544_v5, %s1941_s0 }
 0x132   :  { %662 = vrot.lane.b32.xlu1 %v544_v5, %s1944_s16  ;;  %568 = vrot.lane.b32.xlu0 %v553_v6, %s1942_s14  ;;  %v1183_v5 = vld [vmem:[%s2346_s5] sm:$0xff] }
 0x136   :  { %601 = vrot.lane.b32.xlu0 %v553_v6, %s1941_s0  ;;  %597 = vrot.lane.b32.xlu1 %v552_v9, %s1941_s0 }
 0x13a   :  { %630 = vrot.lane.b32.xlu1 %v552_v9, %s1943_s15  ;;  %564 = vrot.lane.b32.xlu0 %v552_v9, %s1942_s14 }
 0x13e   :  { %666 = vrot.lane.b32.xlu1 %v545_v4, %s1944_s16  ;;  %664 = vrot.lane.b32.xlu0 %v552_v9, %s1944_s16 }
 0x142   :  { %660 = vrot.lane.b32.xlu1 %v551_v60, %s1944_s16  ;;  %626 = vrot.lane.b32.xlu0 %v551_v60, %s1943_s15 }
 0x146   :  { %668 = vrot.lane.b32.xlu1 %v553_v6, %s1944_s16  ;;  %634 = vrot.lane.b32.xlu0 %v553_v6, %s1943_s15  ;;  %v1184_v6 = vld [vmem:[%s2346_s5 + $0x8] sm:$0xff] }
 0x147   :  { %v1833_v8 = vpack.c.bf16 %v1184_v6, %v1183_v5 }
 0x17c   :  { %v592_v11 = vpop.permute.xlu1 %591  ;;  %v559_v12 = vpop.permute.xlu0 %558 }
 0x17d   :  { %581 = vst.msk [vmem:[#allocation2 + $0x10] sm:$0xf] %vm578_vm2, %v559_v12 }
 0x17e   :  { %614 = vst.msk [vmem:[#allocation2 + $0x11] sm:$0xf] %vm611_vm3, %v592_v11 }
 0x180   :  { %v625_v13 = vpop.permute.xlu0 %624  ;;  %v621_v14 = vpop.permute.xlu1 %620 }
 0x184   :  { %v659_v15 = vpop.permute.xlu0 %658  ;;  %v655_v16 = vpop.permute.xlu1 %654 }
 0x188   :  { %v561_v17 = vpop.permute.xlu1 %560  ;;  %v555_v18 = vpop.permute.xlu0 %554 }
 0x189   :  { %582 = vst.msk [vmem:[#allocation2 + $0x18] sm:$0xf] %vm578_vm2, %v561_v17  ;;  %579 = vst.msk [vmem:[#allocation2] sm:$0xf] %vm578_vm2, %v555_v18 }
 0x18c   :  { %v588_v19 = vpop.permute.xlu0 %587  ;;  %v590_v20 = vpop.permute.xlu1 %589 }
 0x18d   :  { %612 = vst.msk [vmem:[#allocation2 + $0x1] sm:$0xf] %vm611_vm3, %v588_v19 }
 0x190   :  { %v594_v21 = vpop.permute.xlu0 %593  ;;  %v623_v22 = vpop.permute.xlu1 %622 }
 0x191   :  { %615 = vst.msk [vmem:[#allocation2 + $0x19] sm:$0xf] %vm611_vm3, %v594_v21 }
 0x192   :  { %647 = vst.msk [vmem:[#allocation2 + $0x10] sm:$0xf] %vm645_vm4, %v623_v22  ;;  %648 = vst.msk [vmem:[#allocation2 + $0x18] sm:$0xf] %vm645_vm4, %v625_v13  ;;  %v1289_v13 = vld [vmem:[%s2348_s7] sm:$0xff] }
 0x193   :  { %681 = vst.msk [vmem:[#allocation2 + $0x19] sm:$0xf] %vm678_vm5, %v659_v15 }
 0x194   :  { %v657_v23 = vpop.permute.xlu1 %656  ;;  %v557_v24 = vpop.permute.xlu0 %556 }
 0x195   :  { %680 = vst.msk [vmem:[#allocation2 + $0x11] sm:$0xf] %vm678_vm5, %v657_v23 }
 0x196   :  { %580 = vst.msk [vmem:[#allocation2 + $0x8] sm:$0xf] %vm578_vm2, %v557_v24 }
 0x197   :  { %613 = vst.msk [vmem:[#allocation2 + $0x9] sm:$0xf] %vm611_vm3, %v590_v20 }
 0x198   :  { %646 = vst.msk [vmem:[#allocation2 + $0x8] sm:$0xf] %vm645_vm4, %v621_v14  ;;  %v633_v25 = vpop.permute.xlu0 %632  ;;  %v567_v26 = vpop.permute.xlu1 %566  ;;  %v1290_v14 = vld [vmem:[%s2348_s7 + $0x8] sm:$0xff] }
 0x199   :  { %679 = vst.msk [vmem:[#allocation2 + $0x9] sm:$0xf] %vm678_vm5, %v655_v16  ;;  %v1837_v15 = vpack.c.bf16 %v1290_v14, %v1289_v13  ;;  %v1504_v16 = vld [vmem:[%s2345_s4] ss:$0 sm:$0xff] }
 0x19a   :  { %585 = vst.msk [vmem:[#allocation2 + $0x38] sm:$0xf] %vm578_vm2, %v567_v26  ;;  %v1292_v26 = vld [vmem:[%s2348_s7 + $0x18] sm:$0xff] }
 0x19c   :  { %v600_v27 = vpop.permute.xlu1 %599  ;;  %v563_v28 = vpop.permute.xlu0 %562  ;;  %v1893_v34 = vld [vmem:[#allocation2 + $0x11] ss:$8 sps:$4 sm:$0xff]  }
 0x19d   :  { %618 = vst.msk [vmem:[#allocation2 + $0x39] sm:$0xf] %vm611_vm3, %v600_v27  ;;  %v1897_v58 = vld [vmem:[#allocation2 + $0x10] ss:$8 sps:$4 sm:$0xff]  }
 0x19e   :  { %583 = vst.msk [vmem:[#allocation2 + $0x28] sm:$0xf] %vm578_vm2, %v563_v28  ;;  %v1505_v28 = vld [vmem:[%s2347_s6] ss:$0 sm:$0xff] }
 0x1a0   :  { %v1892_v31 = vld [vmem:[#allocation2 + $0x1] ss:$8 sps:$4 sm:$0xff]   ;;  %v629_v32 = vpop.permute.xlu1 %628  ;;  %v596_v33 = vpop.permute.xlu0 %595 }
 0x1a1   :  { %616 = vst.msk [vmem:[#allocation2 + $0x29] sm:$0xf] %vm611_vm3, %v596_v33  ;;  %1681 = vmatprep.mubr.msk.f32.mxu1 %vm724_vm6, %v1892_v31  ;;  %v1896_v55 = vld [vmem:[#allocation2] ss:$8 sps:$4 sm:$0xff]  }
 0x1a2   :  { %1682 = vmatmul.mubr.msk.f32.vlgmr.msra.gmra.mrb[0].mxu1 %vm724_vm6, %v1893_v34  ;;  %v1900_v1 = vld [vmem:[#allocation2 + $0x8] ss:$8 sps:$4 sm:$0xff]  }
 0x1a3   :  { %1812 = vmatpush3.bf16.msra.mxu1 %v2181_v10  ;;  %v1904_v9 = vld [vmem:[#allocation2 + $0x9] ss:$8 sps:$4 sm:$0xff]  }
 0x1a4   :  { %v663_v38 = vpop.permute.xlu1 %662  ;;  %v569_v39 = vpop.permute.xlu0 %568  ;;  %1814 = vmatprep.subr.bf16.mxu1 %v1813_v35 }
 0x1a5   :  { %586 = vst.msk [vmem:[#allocation2 + $0x40] sm:$0xf] %vm578_vm2, %v569_v39 }
 0x1a7   :  { %1816 = vmatpush3.bf16.msra.mxu1 %v1813_v35 }
 0x1a8   :  { %v602_v41 = vpop.permute.xlu0 %601  ;;  %v598_v42 = vpop.permute.xlu1 %597  ;;  %1818 = vmatprep.subr.bf16.mxu1 %v1817_v40 }
 0x1a9   :  { %619 = vst.msk [vmem:[#allocation2 + $0x41] sm:$0xf] %vm611_vm3, %v602_v41 }
 0x1aa   :  { %652 = vst.msk [vmem:[#allocation2 + $0x40] sm:$0xf] %vm645_vm4, %v633_v25  ;;  %v1291_v25 = vld [vmem:[%s2348_s7 + $0x10] sm:$0xff]  ;;  %s1945_s7 = smov [#allocation3]  }
 0x1ab   :  { %v1841_v27 = vpack.c.bf16 %v1292_v26, %v1291_v25  ;;  %s1410_s17 = sshll.u32 %s1945_s7, 4  ;;  %s1411_s17 = int_to_ptr.vmem [resolvable:$true] %s1410_s17 }
 0x1ac   :  { %v631_v43 = vpop.permute.xlu1 %630  ;;  %v565_v44 = vpop.permute.xlu0 %564  ;;  %s1916_s6 = scalar_lea.vmem %s1411_s17, 512  ;;  %p1921_p1 = scmp.lt.s32.totalorder %s1411_s17, %s1411_s17 }
 0x1ad   :  { %651 = vst.msk [vmem:[#allocation2 + $0x38] sm:$0xf] %vm645_vm4, %v631_v43  ;;  %p1917_p0 = scmp.ne.s32.totalorder %s1411_s17, %s1916_s6  ;;  %p1922_p2 = scmp.lt.s32.totalorder %s1916_s6, %s1916_s6 }
 0x1ae   :  { %584 = vst.msk [vmem:[#allocation2 + $0x30] sm:$0xf] %vm578_vm2, %v565_v44 }
 0x1af   :  { %617 = vst.msk [vmem:[#allocation2 + $0x31] sm:$0xf] %vm611_vm3, %v598_v42  ;;  %p1923_p3 = por %p1922_p2, %p1921_p1 }
 0x1b0   :  { %650 = vst.msk [vmem:[#allocation2 + $0x30] sm:$0xf] %vm645_vm4, %v629_v32  ;;  %v667_v45 = vpop.permute.xlu1 %666  ;;  %v665_v46 = vpop.permute.xlu0 %664 }
 0x1b1   :  { %683 = vst.msk [vmem:[#allocation2 + $0x31] sm:$0xf] %vm678_vm5, %v663_v38  ;;  %685 = vst.msk [vmem:[#allocation2 + $0x41] sm:$0xf] %vm678_vm5, %v667_v45  ;;  %p1924_p4 = pnand %p1923_p3, %p1917_p0 }
 0x1b2   :  { %684 = vst.msk [vmem:[#allocation2 + $0x39] sm:$0xf] %vm678_vm5, %v665_v46 }
 0x1b4   :  { %v661_v47 = vpop.permute.xlu1 %660  ;;  %v627_v48 = vpop.permute.xlu0 %626 }
 0x1b5   :  { %649 = vst.msk [vmem:[#allocation2 + $0x20] sm:$0xf] %vm645_vm4, %v627_v48 }
 0x1b6   :  { %682 = vst.msk [vmem:[#allocation2 + $0x21] sm:$0xf] %vm678_vm5, %v661_v47 }
 0x1b8   :  { %v1894_v49 = vld [vmem:[#allocation2 + $0x29] ss:$8 sps:$4 sm:$0xff]   ;;  %v669_v52 = vpop.permute.xlu1 %668  ;;  %v635_v53 = vpop.permute.xlu0 %634 }
 0x1b9   :  { %v1895_v54 = vld [vmem:[#allocation2 + $0x39] ss:$8 sps:$4 sm:$0xff]   ;;  %653 = vst.msk [vmem:[#allocation2 + $0x48] sm:$0xf] %vm645_vm4, %v635_v53  ;;  %1684 = vmatprep.mubr.msk.f32.mxu1 %vm724_vm6, %v1894_v49  ;;  %v1898_v60 = vld [vmem:[#allocation2 + $0x28] ss:$8 sps:$4 sm:$0xff]  }
 0x1ba   :  { %686 = vst.msk [vmem:[#allocation2 + $0x49] sm:$0xf] %vm678_vm5, %v669_v52  ;;  %1685 = vmatmul.mubr.msk.f32.gmra.mrb[2].mxu1 %vm724_vm6, %v1895_v54  ;;  %v1899_v61 = vld [vmem:[#allocation2 + $0x38] ss:$8 sps:$4 sm:$0xff]  }
 0x1bb   :  { %1695 = vmatprep.mubr.msk.f32.mxu1 %vm724_vm6, %v1896_v55  ;;  %v1902_v4 = vld [vmem:[#allocation2 + $0x30] ss:$8 sps:$4 sm:$0xff]  }
 0x1bc   :  { %v1906_v11 = vld [vmem:[#allocation2 + $0x31] ss:$8 sps:$4 sm:$0xff]  }
 0x1bd   :  { %v1901_v2 = vld [vmem:[#allocation2 + $0x18] ss:$8 sps:$4 sm:$0xff]  }
 0x1be   :  { %1696 = vmatmul.mubr.msk.f32.vlgmr.msra.gmra.mrb[0].mxu1 %vm724_vm6, %v1897_v58  ;;  %v1905_v10 = vld [vmem:[#allocation2 + $0x19] ss:$8 sps:$4 sm:$0xff]  }
 0x1bf   :  { %1820 = vmatpush3.bf16.msra.mxu1 %v1817_v40  ;;  %1698 = vmatprep.mubr.msk.f32.mxu1 %vm724_vm6, %v1898_v60 }
 0x1c0   :  { %1822 = vmatprep.subr.bf16.mxu1 %v1821_v59 }
 0x1c1   :  { %v1903_v7 = vld [vmem:[#allocation2 + $0x40] ss:$8 sps:$4 sm:$0xff]  }
 0x1c2   :  { %1699 = vmatmul.mubr.msk.f32.gmra.mrb[2].mxu1 %vm724_vm6, %v1899_v61  ;;  %v1907_v12 = vld [vmem:[#allocation2 + $0x41] ss:$8 sps:$4 sm:$0xff]  }
 0x1c3   :  { %1824 = vmatpush3.bf16.msra.mxu1 %v1821_v59  ;;  %1709 = vmatprep.mubr.msk.f32.mxu1 %vm724_vm6, %v1900_v1 }
 0x1c4   :  { %1826 = vmatprep.subr.bf16.mxu1 %v1825_v62 }
 0x1c6   :  { %1710 = vmatmul.mubr.msk.f32.vlgmr.msra.gmra.mrb[0].mxu1 %vm724_vm6, %v1901_v2 }
 0x1c7   :  { %1828 = vmatpush3.bf16.msra.mxu1 %v1825_v62  ;;  %1712 = vmatprep.mubr.msk.f32.mxu1 %vm724_vm6, %v1902_v4 }
 0x1c8   :  { %1830 = vmatprep.subr.bf16.mxu1 %v1829_v3 }
 0x1ca   :  { %1713 = vmatmul.mubr.msk.f32.gmra.mrb[2].mxu1 %vm724_vm6, %v1903_v7 }
 0x1cb   :  { %1832 = vmatpush3.bf16.msra.mxu1 %v1829_v3  ;;  %1723 = vmatprep.mubr.msk.f32.mxu1 %vm724_vm6, %v1904_v9 }
 0x1cc   :  { %1834 = vmatprep.subr.bf16.mxu1 %v1833_v8 }
 0x1ce   :  { %1724 = vmatmul.mubr.msk.f32.vlgmr.msra.gmra.mrb[0].mxu1 %vm724_vm6, %v1905_v10 }
 0x1cf   :  { %1726 = vmatprep.mubr.msk.f32.mxu1 %vm724_vm6, %v1906_v11  ;;  %1836 = vmatpush3.bf16.msra.mxu1 %v1833_v8 }
 0x1d0   :  { %1838 = vmatprep.subr.bf16.mxu1 %v1837_v15 }
 0x1d2   :  { %1727 = vmatmul.mubr.msk.f32.gmra.mrb[2].mxu1 %vm724_vm6, %v1907_v12 }
 0x2a1   :  { %v1725_v17 = vpop.f32.mrb[0].mxu1 }
 0x2a2   :  { %v1175_v18 = vadd.f32 %v1725_v17, %v1504_v16  ;;  %v1144_v19 = vpop.f32.mrb[1].mxu1 }
 0x2a3   :  { %v1174_v20 = vadd.f32 %v1504_v16, %v1144_v19 }
 0x2a4   :  { %1180 = vst.msk [vmem:[#allocation3 + $0x8] sm:$0xff] %vm1178_vm7, %v1175_v18 }
 0x2a5   :  { %1179 = vst.msk [vmem:[#allocation3] sm:$0xff] %vm1178_vm7, %v1174_v20  ;;  %v1728_v21 = vpop.f32.mrb[2].mxu1  ;;  %1733 = vmatprep.mubr.msk.f32.mxu1 %vm1178_vm7, %v1174_v20 }
 0x2a6   :  { %v1177_v22 = vadd.f32 %v1728_v21, %v1504_v16  ;;  %v1154_v23 = vpop.f32.mrb[3].mxu1  ;;  %1734 = vmatmul.mubr.msk.f32.vlgmr.msra.gmra.mrb[4].mxu1 %vm1178_vm7, %v1175_v18 }
 0x2a7   :  { %v1176_v24 = vadd.f32 %v1504_v16, %v1154_v23  ;;  %1840 = vmatpush3.bf16.msra.mxu1 %v1837_v15 }
 0x2a8   :  { %1182 = vst.msk [vmem:[#allocation3 + $0x18] sm:$0xff] %vm1178_vm7, %v1177_v22  ;;  %1842 = vmatprep.subr.bf16.mxu1 %v1841_v27 }
 0x2a9   :  { %1181 = vst.msk [vmem:[#allocation3 + $0x10] sm:$0xff] %vm1178_vm7, %v1176_v24  ;;  %1736 = vmatprep.mubr.msk.f32.mxu1 %vm1178_vm7, %v1176_v24 }
 0x2aa   :  { %1737 = vmatmul.mubr.msk.f32.gmra.mrb[6].mxu1 %vm1178_vm7, %v1177_v22 }
 0x2ab   :  { %1844 = vmatpush3.bf16.msra.mxu1 %v1841_v27 }
 0x379   :  { %v1735_v29 = vpop.f32.mrb[4].mxu1 }
 0x37a   :  { %v1270_v30 = vpop.f32.mrb[5].mxu1  ;;  %v1276_v32 = vadd.f32 %v1735_v29, %v1505_v28 }
 0x37b   :  { %v1271_v31 = vadd.f32 %v1505_v28, %v1270_v30 }
 0x37d   :  { %v1738_v33 = vpop.f32.mrb[6].mxu1  ;;  %1747 = vmatprep.mubr.msk.f32.mxu1 %vm724_vm6, %v1271_v31 }
 0x37e   :  { %v1280_v34 = vpop.f32.mrb[7].mxu1  ;;  %1748 = vmatmul.mubr.msk.f32.vlgmr.msra.gmra.mrb[8].mxu1 %vm724_vm6, %v1276_v32  ;;  %v1286_v36 = vadd.f32 %v1738_v33, %v1505_v28 }
 0x37f   :  { %v1281_v35 = vadd.f32 %v1505_v28, %v1280_v34 }
 0x381   :  { %1750 = vmatprep.mubr.msk.f32.mxu1 %vm724_vm6, %v1281_v35 }
 0x382   :  { %1751 = vmatmul.mubr.msk.f32.gmra.mrb[10].mxu1 %vm724_vm6, %v1286_v36 }
 0x383   :  { %1927 = shalt.err (!%p1924_p4)
}
 0x384   :  { %s1928_s20 = scalar_lea.hbm %s2350_s9, 512 }
 0x385   :  { %p1929_p5 = scmp.ne.s32.totalorder %s2350_s9, %s1928_s20  ;;  %p1932_p6 = scmp.lt.u32.totalorder %s1928_s20, %s2350_s9 }
 0x387   :  { %p1934_p7 = pnand %p1932_p6, %p1929_p5 }
 0x389   :  { %1937 = shalt.err (!%p1934_p7)
}
 0x38a   :  { %s1946_s25 = smov 128   ;;  %v1510_v37 = vld [vmem:[%s2349_s8] ss:$0 sm:$0xff] }
 0x38b   :  { %1416 = dma.vmem_to_hbm [thread:$0]  %s1411_s17, 512, %s2350_s9, [#allocation4], %s1946_s25, %s1946_s25, %s1941_s0  }
 0x451   :  { %v1749_v38 = vpop.f32.mrb[8].mxu1 }
 0x452   :  { %v1384_v39 = vadd.f32 %v1749_v38, %v1510_v37  ;;  %v1378_v40 = vpop.f32.mrb[9].mxu1 }
 0x453   :  { %v1379_v41 = vadd.f32 %v1510_v37, %v1378_v40 }
 0x454   :  { %1908 = vtanh.f32 %v1384_v39 }
 0x455   :  { %1910 = vtanh.f32 %v1379_v41  ;;  %v1752_v42 = vpop.f32.mrb[10].mxu1 }
 0x456   :  { %v1394_v43 = vadd.f32 %v1752_v42, %v1510_v37  ;;  %v1388_v44 = vpop.f32.mrb[11].mxu1 }
 0x457   :  { %v1389_v45 = vadd.f32 %v1510_v37, %v1388_v44 }
 0x458   :  { %1912 = vtanh.f32 %v1394_v43 }
 0x459   :  { %1914 = vtanh.f32 %v1389_v45 }
 0x45e   :  { %v1909_v46 = vpop.eup %1908 }
 0x45f   :  { %v1911_v47 = vpop.eup %1910  ;;  %1402 = vst.msk [vmem:[%s2351_s10 + $0x8] sm:$0xff] %vm87_vm0, %v1909_v46 }
 0x460   :  { %1401 = vst.msk [vmem:[%s2351_s10] sm:$0xff] %vm87_vm0, %v1911_v47 }
 0x462   :  { %v1913_v48 = vpop.eup %1912 }
 0x463   :  { %v1915_v49 = vpop.eup %1914  ;;  %1404 = vst.msk [vmem:[%s2351_s10 + $0x18] sm:$0xff] %vm87_vm0, %v1913_v48 }
 0x464   :  { %1403 = vst.msk [vmem:[%s2351_s10 + $0x10] sm:$0xff] %vm87_vm0, %v1915_v49 }
 0x465   :  { %1938 = dma.done.wait [#allocation4], 512  }
 0x466   :  { %1939 = vsyncadd [#allocation4], 4294966784 }
 0x467   :  { %1424 = vsyncpa [#allocation4], 1 }

</bundles_post_ra>
